<compile_context>
chip_gen: v5e
topology: v5e:2x2
jax: 0.10.0
libtpu: 0.0.40
codegen_flags: <defaults>
</compile_context>

<pallas_src>
import jax
import jax.numpy as jnp
import numpy as np
from jax.experimental import pallas as pl
from jax.experimental.pallas import tpu as pltpu

EXPANSION = 4     # Bottleneck expansion


def _round_up(x, m):
    return (x + m - 1) // m * m


def _choose_tile(dim, align, cap):
    """Tile size (multiple of `align`, <= cap) and padded dim (= tile * nblocks).

    Scans a few block counts near the minimum and keeps the split with the
    least zero padding (ties -> fewer, larger blocks).  Avoids the degenerate
    tiny tiles a strict-divisibility rule produces for awkward M/K values.
    """
    dim_a = _round_up(dim, align)
    if dim_a <= cap:
        return dim_a, dim_a
    nb_min = -(-dim_a // cap)
    best = None
    for nb in range(nb_min, nb_min + 3):
        t = _round_up(-(-dim // nb), align)
        pad = t * nb - dim
        if best is None or pad < best[0]:
            best = (pad, t, nb)
        if pad == 0:
            break
    _, t, nb = best
    return t, t * nb


# ------------------ fused conv-as-matmul Pallas kernel ----------------------

def _make_mm_kernel(act, has_res):
    """acc += A@W (bf16 in, f32 acc); epilogue: + shift [+ residual] -> act."""
    def kernel(*refs):
        if act == "prelu":
            if has_res:
                a_ref, w_ref, sh_ref, al_ref, r_ref, o_ref, acc_ref = refs
            else:
                a_ref, w_ref, sh_ref, al_ref, o_ref, acc_ref = refs
        else:
            al_ref = None
            if has_res:
                a_ref, w_ref, sh_ref, r_ref, o_ref, acc_ref = refs
            else:
                a_ref, w_ref, sh_ref, o_ref, acc_ref = refs

        k = pl.program_id(2)

        @pl.when(k == 0)
        def _():
            acc_ref[...] = jnp.zeros_like(acc_ref)

        acc_ref[...] += jnp.dot(a_ref[...], w_ref[...],
                                preferred_element_type=jnp.float32)

        @pl.when(k == pl.num_programs(2) - 1)
        def _():
            y = acc_ref[...] + sh_ref[...]
            if has_res:
                y = y + r_ref[...].astype(jnp.float32)
            if act == "relu":
                y = jnp.maximum(y, 0.0)
            elif act == "prelu":
                y = jnp.where(y > 0.0, y, al_ref[...] * y)
            o_ref[...] = y.astype(o_ref.dtype)

    return kernel


def fused_matmul(a, w, shift, *, act="none", alpha=None, residual=None):
    """act((A @ W) + shift [+ residual]) -> bf16.

    a: (M, K) bf16, w: (K, N) bf16 (BN scale pre-folded), shift/alpha: (N,)
    f32, residual: (M, N) bf16.  3-D grid (M, N, K) with K innermost
    ("arbitrary") and an f32 VMEM accumulator; bf16 output halves the
    writeback / next-layer read traffic.
    """
    M, K = a.shape
    N = w.shape[1]

    TM, Mp = _choose_tile(M, 16, 512)     # 16-aligned sublanes (bf16 tiles)
    TN, Np = _choose_tile(N, 128, 512)    # full lane width
    TK, Kp = _choose_tile(K, 128, 1024)   # big K tiles -> fewer grid steps

    a_p = a if (Mp == M and Kp == K) else jnp.pad(a, ((0, Mp - M), (0, Kp - K)))
    w_p = w if (Kp == K and Np == N) else jnp.pad(w, ((0, Kp - K), (0, Np - N)))
    shift_p = (shift if Np == N else jnp.pad(shift, (0, Np - N))).reshape(1, Np)

    inputs = [a_p, w_p, shift_p]
    in_specs = [
        pl.BlockSpec((TM, TK), lambda i, j, k: (i, k)),
        pl.BlockSpec((TK, TN), lambda i, j, k: (k, j)),
        pl.BlockSpec((1, TN), lambda i, j, k: (0, j)),
    ]
    if act == "prelu":
        alpha_p = (alpha if Np == N else jnp.pad(alpha, (0, Np - N))).reshape(1, Np)
        inputs.append(alpha_p)
        in_specs.append(pl.BlockSpec((1, TN), lambda i, j, k: (0, j)))
    has_res = residual is not None
    if has_res:
        res_p = residual.astype(jnp.bfloat16)
        if Mp != M or Np != N:
            res_p = jnp.pad(res_p, ((0, Mp - M), (0, Np - N)))
        inputs.append(res_p)
        in_specs.append(pl.BlockSpec((TM, TN), lambda i, j, k: (i, j)))

    # Double-buffered bf16 in/out blocks + f32 accumulator; cap well under the
    # v7x 64 MiB VMEM so the same config is safe on every generation.
    vmem_bytes = (2 * (TM * TK * 2 + TK * TN * 2 + TM * TN * 2
                       + (TM * TN * 2 if has_res else 0) + 4 * TN * 4)
                  + TM * TN * 4)
    vmem_limit = int(min(max(2 * vmem_bytes, 16 * 1024 * 1024),
                         40 * 1024 * 1024))

    out = pl.pallas_call(
        _make_mm_kernel(act, has_res),
        out_shape=jax.ShapeDtypeStruct((Mp, Np), jnp.bfloat16),
        grid=(Mp // TM, Np // TN, Kp // TK),
        in_specs=in_specs,
        out_specs=pl.BlockSpec((TM, TN), lambda i, j, k: (i, j)),
        scratch_shapes=[pltpu.VMEM((TM, TN), jnp.float32)],
        compiler_params=pltpu.CompilerParams(
            dimension_semantics=("parallel", "parallel", "arbitrary"),
            vmem_limit_bytes=vmem_limit),
    )(*inputs)
    if Mp != M or Np != N:
        out = out[:M, :N]
    return out


# ----------------------------- maxpool kernel -------------------------------

def maxpool_3x3_s2_p1(x):
    """MaxPool2d(kernel_size=3, stride=2, padding=1) on NHWC (bf16).

    The three column taps (stride-2 along W) are reduced with XLA strided
    slices (strided reads inside a TPU kernel are not portably supported);
    the three row taps and the stride-2 row selection run in a Pallas kernel
    whose input BlockSpecs read rows 2r, 2r+1, 2r+2 of the column-pooled
    tensor directly (full batch / width / channels per grid step).
    """
    n, h, w_, c = x.shape
    oh = (h - 1) // 2 + 1
    ow = (w_ - 1) // 2 + 1
    xp = jnp.pad(x, ((0, 0), (1, 1), (1, 1), (0, 0)),
                 constant_values=-jnp.inf)            # bf16 pad, half the bytes of f32
    # column pooling: window 3, stride 2  ->  (n, h+2, ow, c)
    c0 = xp[:, :, 0:2 * ow - 1:2, :]
    c1 = xp[:, :, 1:2 * ow:2, :]
    c2 = xp[:, :, 2:2 * ow + 1:2, :]
    cw = jnp.maximum(jnp.maximum(c0, c1), c2)

    def kernel(r0_ref, r1_ref, r2_ref, o_ref):
        o_ref[...] = jnp.maximum(jnp.maximum(r0_ref[...], r1_ref[...]),
                                 r2_ref[...])

    def row_spec(tap):
        return pl.BlockSpec((n, 1, ow, c),
                            lambda r, tap=tap: (0, 2 * r + tap, 0, 0))

    return pl.pallas_call(
        kernel,
        out_shape=jax.ShapeDtypeStruct((n, oh, ow, c), x.dtype),
        grid=(oh,),
        in_specs=[row_spec(0), row_spec(1), row_spec(2)],
        out_specs=pl.BlockSpec((n, 1, ow, c), lambda r: (0, r, 0, 0)),
        compiler_params=pltpu.CompilerParams(
            dimension_semantics=("parallel",)),
    )(cw, cw, cw)


# ------------------------------- glue (JAX) ---------------------------------

def im2col(x, kh, kw, stride, dilation, padding):
    """x: NHWC (bf16), symmetric zero pad -> ((M, kh*kw*C), (n, oh, ow))."""
    n, h, w_, c = x.shape
    xp = jnp.pad(x, ((0, 0), (padding, padding), (padding, padding), (0, 0)))
    hp, wp = h + 2 * padding, w_ + 2 * padding
    eff_h = dilation * (kh - 1) + 1
    eff_w = dilation * (kw - 1) + 1
    oh = (hp - eff_h) // stride + 1
    ow = (wp - eff_w) // stride + 1
    cols = []
    for i in range(kh):
        for j in range(kw):
            patch = jax.lax.slice(
                xp, (0, i * dilation, j * dilation, 0),
                (n, i * dilation + (oh - 1) * stride + 1,
                 j * dilation + (ow - 1) * stride + 1, c),
                (1, stride, stride, 1))
            cols.append(patch)
    patches = jnp.stack(cols, axis=3)          # (n, oh, ow, kh*kw, c)
    return patches.reshape(n * oh * ow, kh * kw * c), (n, oh, ow)


def bn_scale_shift(bn, eps=1e-5):
    scale = bn["gamma"] * jax.lax.rsqrt(bn["var"] + eps)
    shift = bn["beta"] - bn["mean"] * scale
    return scale, shift


def conv_bn_act(x, w, bn, *, stride=1, dilation=1, padding=0,
                act="none", alpha=None, residual=None):
    """Conv2d(bias=False) -> BatchNorm -> [+residual] -> activation. NHWC bf16."""
    kh, kw, cin, cout = w.shape
    scale, shift = bn_scale_shift(bn)
    # Fold BN scale into the conv weights; only the shift lives in the epilogue.
    w_folded = (w * scale[None, None, None, :]).reshape(kh * kw * cin, cout)
    if kh == 1 and kw == 1 and padding == 0 and dilation == 1:
        # 1x1 conv: no im2col at all, just a (strided) reshape.
        xs = x if stride == 1 else x[:, ::stride, ::stride, :]
        n, oh, ow = xs.shape[0], xs.shape[1], xs.shape[2]
        a = xs.reshape(n * oh * ow, cin)
    else:
        a, (n, oh, ow) = im2col(x, kh, kw, stride, dilation, padding)
    res = residual.reshape(n * oh * ow, cout) if residual is not None else None
    y = fused_matmul(a, w_folded.astype(jnp.bfloat16), shift,
                     act=act, alpha=alpha, residual=res)
    return y.reshape(n, oh, ow, cout)


# ----------------------------- parameter init -------------------------------

class KeyGen:
    def __init__(self, seed=0):
        self._key = jax.random.PRNGKey(seed)

    def __call__(self):
        self._key, sub = jax.random.split(self._key)
        return sub


def init_conv(kg, kh, kw, cin, cout):
    fan_in = kh * kw * cin
    return (jax.random.normal(kg(), (kh, kw, cin, cout), jnp.float32)
            * (1.0 / np.sqrt(fan_in)))


def init_bn(kg, c):
    return dict(
        gamma=1.0 + 0.1 * jax.random.normal(kg(), (c,), jnp.float32),
        beta=0.1 * jax.random.normal(kg(), (c,), jnp.float32),
        mean=0.1 * jax.random.normal(kg(), (c,), jnp.float32),
        var=1.0 + 0.1 * jax.random.uniform(kg(), (c,), jnp.float32),
    )


def init_resnet_params(seed, layers, output_stride):
    if output_stride == 16:
        strides, dilations = [1, 2, 2, 1], [1, 1, 1, 2]
    elif output_stride == 8:
        strides, dilations = [1, 2, 1, 1], [1, 1, 2, 4]
    else:
        raise NotImplementedError
    kg = KeyGen(seed)
    params = {
        "conv1_w": init_conv(kg, 7, 7, 3, 64),
        "bn1": init_bn(kg, 64),
        # nn.PReLU(64) default init
        "prelu_alpha": jnp.full((64,), 0.25, jnp.float32),
        "layers": [],
    }
    inplanes = 64
    for planes, nblocks, stride, dilation in zip(
            [64, 128, 256, 512], layers, strides, dilations):
        layer_params = []
        for b in range(nblocks):
            s = stride if b == 0 else 1
            d = dilation if b == 0 else 1
            p = {
                "w1": init_conv(kg, 1, 1, inplanes, planes),
                "bn1": init_bn(kg, planes),
                "w2": init_conv(kg, 3, 3, planes, planes),
                "bn2": init_bn(kg, planes),
                "w3": init_conv(kg, 1, 1, planes, planes * EXPANSION),
                "bn3": init_bn(kg, planes * EXPANSION),
                "stride": s,
                "dilation": d,
            }
            if b == 0 and (stride != 1 or inplanes != planes * EXPANSION):
                # downsample = SeparableConv2d(inplanes, planes*4, k=1, stride,
                #              bias=False) + BN.  fixed_padding(k=1) is a no-op
                # and the 1x1 depthwise conv is a per-channel scale, folded
                # into the 1x1 pointwise weight.
                dw = jax.random.normal(kg(), (inplanes,), jnp.float32)
                pw = init_conv(kg, 1, 1, inplanes, planes * EXPANSION)
                p["down_w"] = pw * dw[None, None, :, None]
                p["down_bn"] = init_bn(kg, planes * EXPANSION)
            layer_params.append(p)
            inplanes = planes * EXPANSION
        params["layers"].append(layer_params)
    return params


# -------------------------------- forward -----------------------------------

def bottleneck_forward(x, p):
    identity = x
    out = conv_bn_act(x, p["w1"], p["bn1"], act="relu")
    out = conv_bn_act(out, p["w2"], p["bn2"], stride=p["stride"],
                      dilation=p["dilation"], padding=p["dilation"],
                      act="relu")
    if "down_w" in p:
        identity = conv_bn_act(x, p["down_w"], p["down_bn"],
                               stride=p["stride"])
    # conv3 -> bn3 -> (+ identity) -> relu, fused into one kernel call.
    out = conv_bn_act(out, p["w3"], p["bn3"], act="relu", residual=identity)
    return out


def resnet_forward(params, x_nchw):
    # NCHW -> NHWC, single cast to bf16; activations stay bf16 end-to-end.
    x = jnp.transpose(x_nchw, (0, 2, 3, 1)).astype(jnp.bfloat16)
    # stem: conv1 (7x7/2) -> bn1 -> PReLU  fused into one Pallas call
    x = conv_bn_act(x, params["conv1_w"], params["bn1"], stride=2, padding=3,
                    act="prelu", alpha=params["prelu_alpha"])
    x = maxpool_3x3_s2_p1(x)
    feats = []
    for layer_params in params["layers"]:
        for p in layer_params:
            x = bottleneck_forward(x, p)
        feats.append(jnp.transpose(x, (0, 3, 1, 2)).astype(jnp.float32))
    c1, c2, c3, c4 = feats
    return c1, c2, c3, c4


# --------------------------------- main --------------------------------------

if __name__ == "__main__":
    x = jax.random.normal(jax.random.PRNGKey(0), (2, 3, 16, 16), jnp.float32)
    params = init_resnet_params(seed=0, layers=[1, 1, 1, 1], output_stride=16)

    c1, c2, c3, c4 = resnet_forward(params, x)
    for t in (c1, c2, c3, c4):
        jax.block_until_ready(t)

    assert c1.shape == (2, 64 * EXPANSION, 4, 4), c1.shape
    assert c2.shape == (2, 128 * EXPANSION, 2, 2), c2.shape
    assert c3.shape == (2, 256 * EXPANSION, 1, 1), c3.shape
    assert c4.shape == (2, 512 * EXPANSION, 1, 1), c4.shape
    print("KERNEL_OK")
</pallas_src>

<mosaic_0001>
module attributes {stable_mosaic.version = 11 : i64} {
  func.func @kernel(%arg0: i32, %arg1: i32, %arg2: i32, %arg3: memref<128x256xbf16, #tpu.memory_space<vmem>>, %arg4: memref<256x128xbf16, #tpu.memory_space<vmem>>, %arg5: memref<1x128xf32, #tpu.memory_space<vmem>>, %arg6: memref<1x128xf32, #tpu.memory_space<vmem>>, %arg7: memref<128x128xbf16, #tpu.memory_space<vmem>>, %arg8: memref<128x128xf32, #tpu.memory_space<vmem>>) attributes {dimension_semantics = [#tpu.dimension_semantics<parallel>, #tpu.dimension_semantics<parallel>, #tpu.dimension_semantics<arbitrary>], iteration_bounds = array<i64: 1, 1, 1>, scalar_prefetch = 0 : i64, scratch_operands = 1 : i64, tpu.core_type = #tpu.core_type<tc>, window_params = [{transform_indices = @transform_0, window_bounds = array<i64: 128, 256>}, {transform_indices = @transform_1, window_bounds = array<i64: 256, 128>}, {transform_indices = @transform_2, window_bounds = array<i64: 1, 128>}, {transform_indices = @transform_3, window_bounds = array<i64: 1, 128>}, {transform_indices = @transform_4, window_bounds = array<i64: 128, 128>}]} {
    %c0_i32 = arith.constant 0 : i32
    %0 = arith.cmpi eq, %arg2, %c0_i32 : i32
    %1 = arith.extui %0 : i1 to i32
    %c0_i32_0 = arith.constant 0 : i32
    %2 = arith.cmpi ne, %1, %c0_i32_0 : i32
    scf.if %2 {
      %cst_10 = arith.constant 0.000000e+00 : f32
      %12 = vector.broadcast %cst_10 : f32 to vector<128x128xf32>
      %c0_11 = arith.constant 0 : index
      %c0_12 = arith.constant 0 : index
      %13 = vector.load %arg8[%c0_11, %c0_12] : memref<128x128xf32, #tpu.memory_space<vmem>>, vector<128x128xf32>
      tpu.vector_store %arg8[%c0_11, %c0_12], %12 {strides = array<i32>} : memref<128x128xf32, #tpu.memory_space<vmem>>, vector<128x128xf32>,
    } else {
    }
    %c0 = arith.constant 0 : index
    %c0_1 = arith.constant 0 : index
    %3 = vector.load %arg8[%c0, %c0_1] : memref<128x128xf32, #tpu.memory_space<vmem>>, vector<128x128xf32>
    %c0_2 = arith.constant 0 : index
    %c0_3 = arith.constant 0 : index
    %4 = vector.load %arg3[%c0_2, %c0_3] : memref<128x256xbf16, #tpu.memory_space<vmem>>, vector<128x256xbf16>
    %c0_4 = arith.constant 0 : index
    %c0_5 = arith.constant 0 : index
    %5 = vector.load %arg4[%c0_4, %c0_5] : memref<256x128xbf16, #tpu.memory_space<vmem>>, vector<256x128xbf16>
    %cst = arith.constant dense<0.000000e+00> : vector<128x128xf32>
    %6 = tpu.matmul %4, %5, %cst {dimension_numbers = #tpu.dot_dimension_numbers<[1], [0], [0], [1], [0, 0, 1, 1], [], []>} : vector<128x256xbf16>, vector<256x128xbf16>, vector<128x128xf32> -> vector<128x128xf32>
    %7 = arith.addf %3, %6 : vector<128x128xf32>
    %c0_6 = arith.constant 0 : index
    %c0_7 = arith.constant 0 : index
    %8 = vector.load %arg8[%c0_6, %c0_7] : memref<128x128xf32, #tpu.memory_space<vmem>>, vector<128x128xf32>
    tpu.vector_store %arg8[%c0_6, %c0_7], %7 {strides = array<i32>} : memref<128x128xf32, #tpu.memory_space<vmem>>, vector<128x128xf32>,
    %c0_i32_8 = arith.constant 0 : i32
    %9 = arith.cmpi eq, %arg2, %c0_i32_8 : i32
    %10 = arith.extui %9 : i1 to i32
    %c0_i32_9 = arith.constant 0 : i32
    %11 = arith.cmpi ne, %10, %c0_i32_9 : i32
    scf.if %11 {
      %c0_10 = arith.constant 0 : index
      %c0_11 = arith.constant 0 : index
      %12 = vector.load %arg8[%c0_10, %c0_11] : memref<128x128xf32, #tpu.memory_space<vmem>>, vector<128x128xf32>
      %c0_12 = arith.constant 0 : index
      %c0_13 = arith.constant 0 : index
      %13 = vector.load %arg5[%c0_12, %c0_13] : memref<1x128xf32, #tpu.memory_space<vmem>>, vector<1x128xf32>
      %14 = vector.broadcast %13 : vector<1x128xf32> to vector<128x128xf32>
      %15 = arith.addf %12, %14 : vector<128x128xf32>
      %cst_14 = arith.constant 0.000000e+00 : f32
      %16 = vector.broadcast %cst_14 : f32 to vector<128x128xf32>
      %17 = arith.cmpf ogt, %15, %16 : vector<128x128xf32>
      %c0_15 = arith.constant 0 : index
      %c0_16 = arith.constant 0 : index
      %18 = vector.load %arg6[%c0_15, %c0_16] : memref<1x128xf32, #tpu.memory_space<vmem>>, vector<1x128xf32>
      %19 = vector.broadcast %18 : vector<1x128xf32> to vector<128x128xf32>
      %20 = arith.mulf %19, %15 : vector<128x128xf32>
      %21 = arith.select %17, %15, %20 : vector<128x128xi1>, vector<128x128xf32>
      %22 = arith.truncf %21 : vector<128x128xf32> to vector<128x128xbf16>
      %c0_17 = arith.constant 0 : index
      %c0_18 = arith.constant 0 : index
      %23 = vector.load %arg7[%c0_17, %c0_18] : memref<128x128xbf16, #tpu.memory_space<vmem>>, vector<128x128xbf16>
      tpu.vector_store %arg7[%c0_17, %c0_18], %22 {strides = array<i32>} : memref<128x128xbf16, #tpu.memory_space<vmem>>, vector<128x128xbf16>,
    } else {
    }
    return
  }
  func.func @transform_0(%arg0: i32, %arg1: i32, %arg2: i32) -> (i32, i32) {
    %c0_i32 = arith.constant 0 : i32
    return %arg0, %arg2 : i32, i32
  }
  func.func @transform_1(%arg0: i32, %arg1: i32, %arg2: i32) -> (i32, i32) {
    %c0_i32 = arith.constant 0 : i32
    return %arg2, %arg1 : i32, i32
  }
  func.func @transform_2(%arg0: i32, %arg1: i32, %arg2: i32) -> (i32, i32) {
    %c0_i32 = arith.constant 0 : i32
    %c0_i32_0 = arith.constant 0 : i32
    return %c0_i32, %arg1 : i32, i32
  }
  func.func @transform_3(%arg0: i32, %arg1: i32, %arg2: i32) -> (i32, i32) {
    %c0_i32 = arith.constant 0 : i32
    %c0_i32_0 = arith.constant 0 : i32
    return %c0_i32, %arg1 : i32, i32
  }
  func.func @transform_4(%arg0: i32, %arg1: i32, %arg2: i32) -> (i32, i32) {
    %c0_i32 = arith.constant 0 : i32
    return %arg0, %arg1 : i32, i32
  }
}

</mosaic_0001>

<bundles_post_ra>
// kernel: tpu_custom_call.1
= control target key start
LH: loop header
LB: loop body
LE: loop exit
PB: predicated region body
PF: predicated region fallthrough
CT: control target
= control target key end

     0   :  { %9 = vsyncpa [#allocation4], 0  ;;  %s982_s0 = inlined_call_operand.hbm [shape: bf16[128,256], index: 0, kind: input, shape index: {}]   ;;  %s983_s1 = inlined_call_operand.hbm [shape: bf16[256,128], index: 1, kind: input, shape index: {}]   ;;  %s984_s2 = inlined_call_operand.vmem [shape: f32[1,128], index: 2, kind: input, shape index: {}]   ;;  %s985_s3 = inlined_call_operand.vmem [shape: f32[1,128], index: 3, kind: input, shape index: {}]   ;;  %s986_s4 = inlined_call_operand.hbm [shape: bf16[128,128], index: 4, kind: output, shape index: {}]  }
   0x1   :  { %10 = vsyncpa [#allocation7], 0 }
   0x2   :  { %11 = vsyncpa [#allocation5], 0  ;;  %s16_s17 = sshll.u32 %s982_s0, 4  ;;  %s893_s18 = smov [#allocation3]   ;;  %s17_s17 = int_to_ptr.hbm [resolvable:$true] %s16_s17 }
   0x3   :  { %s18_s19 = sshll.u32 %s893_s18, 4  ;;  %s29_s22 = sshll.u32 %s983_s1, 4  ;;  %s19_s19 = int_to_ptr.vmem [resolvable:$true] %s18_s19  ;;  %s30_s22 = int_to_ptr.hbm [resolvable:$true] %s29_s22 }
   0x4   :  { %s894_s23 = smov 128   ;;  %s895_s24 = smov 8  }
   0x5   :  { %24 = dma.hbm_to_vmem [thread:$0]  %s17_s17, 2048, %s19_s19, [#allocation4], %s894_s23, %s894_s23, %s895_s24  }
   0x6   :  { %s896_s25 = smov [#allocation6]   ;;  %s897_s27 = smov 64  }
   0x7   :  { %s31_s26 = sshll.u32 %s896_s25, 4  ;;  %s898_s28 = smov 4   ;;  %s32_s26 = int_to_ptr.vmem [resolvable:$true] %s31_s26 }
   0x8   :  { %37 = dma.hbm_to_vmem [thread:$0]  %s30_s22, 2048, %s32_s26, [#allocation7], %s897_s27, %s897_s27, %s898_s28  }
   0x9   :  { %887 = dma.done.wait [#allocation4], 2048  }
   0xa   :  { %888 = vsyncadd [#allocation4], 4294965248 }
   0xb   :  { %889 = dma.done.wait [#allocation7], 2048  }
   0xc   :  { %890 = vsyncadd [#allocation7], 4294965248  ;;  %v734_v0 = vld [vmem:[#allocation6 + $0x38] sm:$0xff]  ;;  %v733_v2 = vld [vmem:[#allocation6 + $0x30] sm:$0xff]  ;;  %s569_s7 = sshll.u32 %s986_s4, 4  ;;  %s570_s7 = int_to_ptr.hbm [resolvable:$true] %s569_s7 }
   0xd   :  { %v742_v1 = vld [vmem:[#allocation6 + $0x78] sm:$0xff]  ;;  %310 = vmatpush.bf16.msra.mxu0 %v734_v0  ;;  %790 = vmatpush.bf16.msra.mxu2 %v734_v0  ;;  %v741_v3 = vld [vmem:[#allocation6 + $0x70] sm:$0xff]  ;;  %v732_v4 = vld [vmem:[#allocation6 + $0x28] sm:$0xff] }
   0xe   :  { %359 = vmatpush.bf16.msra.mxu1 %v742_v1  ;;  %798 = vmatpush.bf16.msra.mxu3 %v742_v1  ;;  %v740_v5 = vld [vmem:[#allocation6 + $0x68] sm:$0xff]  ;;  %v731_v6 = vld [vmem:[#allocation6 + $0x20] sm:$0xff]  ;;  %v730_v8 = vld [vmem:[#allocation6 + $0x18] sm:$0xff] }
   0xf   :  { %v739_v7 = vld [vmem:[#allocation6 + $0x60] sm:$0xff]  ;;  %v738_v9 = vld [vmem:[#allocation6 + $0x58] sm:$0xff]  ;;  %v729_v10 = vld [vmem:[#allocation6 + $0x10] sm:$0xff] }
  0x10   :  { %v737_v11 = vld [vmem:[#allocation6 + $0x50] sm:$0xff]  ;;  %v728_v12 = vld [vmem:[#allocation6 + $0x8] sm:$0xff]  ;;  %v727_v14 = vld [vmem:[#allocation6] sm:$0xff] }
  0x11   :  { %311 = vmatpush.bf16.msra.mxu0 %v733_v2  ;;  %791 = vmatpush.bf16.msra.mxu2 %v733_v2  ;;  %v736_v13 = vld [vmem:[#allocation6 + $0x48] sm:$0xff]  ;;  %v735_v15 = vld [vmem:[#allocation6 + $0x40] sm:$0xff]  ;;  %v593_v28 = vld [vmem:[#allocation3 + $0x10] sm:$0xf] }
  0x12   :  { %360 = vmatpush.bf16.msra.mxu1 %v741_v3  ;;  %799 = vmatpush.bf16.msra.mxu3 %v741_v3  ;;  %v585_v16 = vld [vmem:[#allocation3] sm:$0xf]  ;;  %v712_v17 = vld [vmem:[#allocation3 + $0x4] sm:$0xf0]  ;;  %v711_v20 = vld [vmem:[#allocation3 + $0x4] sm:$0xf] }
  0x13   :  { %v617_v18 = vld [vmem:[#allocation3 + $0x40] sm:$0xf]  ;;  %v720_v19 = vld [vmem:[#allocation3 + $0x44] sm:$0xf0]  ;;  %v587_v21 = vld [vmem:[#allocation3 + $0x8] sm:$0xf0]  ;;  %v586_v24 = vor.u32 %v712_v17, %v585_v16 }
  0x14   :  { %v719_v22 = vld [vmem:[#allocation3 + $0x44] sm:$0xf]  ;;  %v619_v23 = vld [vmem:[#allocation3 + $0x48] sm:$0xf0]  ;;  %v618_v25 = vor.u32 %v720_v19, %v617_v18  ;;  %v590_v26 = vor.u32 %v711_v20, %v587_v21  ;;  %v714_v29 = vld [vmem:[#allocation3 + $0x14] sm:$0xf0] }
  0x15   :  { %312 = vmatpush.bf16.msra.mxu0 %v732_v4  ;;  %792 = vmatpush.bf16.msra.mxu2 %v732_v4  ;;  %v622_v27 = vor.u32 %v719_v22, %v619_v23  ;;  %v625_v30 = vld [vmem:[#allocation3 + $0x50] sm:$0xf]  ;;  %v722_v31 = vld [vmem:[#allocation3 + $0x54] sm:$0xf0]  ;;  %v713_v32 = vld [vmem:[#allocation3 + $0x14] sm:$0xf]  ;;  %v594_v36 = vor.u32 %v714_v29, %v593_v28 }
  0x16   :  { %361 = vmatpush.bf16.msra.mxu1 %v740_v5  ;;  %800 = vmatpush.bf16.msra.mxu3 %v740_v5  ;;  %v595_v33 = vld [vmem:[#allocation3 + $0x18] sm:$0xf0]  ;;  %v721_v34 = vld [vmem:[#allocation3 + $0x54] sm:$0xf]  ;;  %v626_v37 = vor.u32 %v722_v31, %v625_v30  ;;  %v601_v40 = vld [vmem:[#allocation3 + $0x20] sm:$0xf] }
  0x17   :  { %v627_v35 = vld [vmem:[#allocation3 + $0x58] sm:$0xf0]  ;;  %v598_v38 = vor.u32 %v713_v32, %v595_v33  ;;  %v716_v41 = vld [vmem:[#allocation3 + $0x24] sm:$0xf0]  ;;  %v633_v42 = vld [vmem:[#allocation3 + $0x60] sm:$0xf] }
  0x18   :  { %v630_v39 = vor.u32 %v721_v34, %v627_v35  ;;  %v724_v43 = vld [vmem:[#allocation3 + $0x64] sm:$0xf0]  ;;  %v715_v44 = vld [vmem:[#allocation3 + $0x24] sm:$0xf]  ;;  %v603_v45 = vld [vmem:[#allocation3 + $0x28] sm:$0xf0]  ;;  %v602_v48 = vor.u32 %v716_v41, %v601_v40 }
  0x19   :  { %313 = vmatpush.bf16.msra.mxu0 %v731_v6  ;;  %793 = vmatpush.bf16.msra.mxu2 %v731_v6  ;;  %v723_v46 = vld [vmem:[#allocation3 + $0x64] sm:$0xf]  ;;  %v635_v47 = vld [vmem:[#allocation3 + $0x68] sm:$0xf0]  ;;  %v634_v49 = vor.u32 %v724_v43, %v633_v42  ;;  %v606_v50 = vor.u32 %v715_v44, %v603_v45  ;;  %v609_v52 = vld [vmem:[#allocation3 + $0x30] sm:$0xf] }
  0x1a   :  { %362 = vmatpush.bf16.msra.mxu1 %v739_v7  ;;  %801 = vmatpush.bf16.msra.mxu3 %v739_v7  ;;  %v638_v51 = vor.u32 %v723_v46, %v635_v47  ;;  %v718_v53 = vld [vmem:[#allocation3 + $0x34] sm:$0xf0]  ;;  %v641_v54 = vld [vmem:[#allocation3 + $0x70] sm:$0xf]  ;;  %v717_v56 = vld [vmem:[#allocation3 + $0x34] sm:$0xf] }
  0x1b   :  { %v726_v55 = vld [vmem:[#allocation3 + $0x74] sm:$0xf0]  ;;  %v611_v57 = vld [vmem:[#allocation3 + $0x38] sm:$0xf0]  ;;  %v725_v58 = vld [vmem:[#allocation3 + $0x74] sm:$0xf]  ;;  %v610_v60 = vor.u32 %v718_v53, %v609_v52 }
  0x1c   :  { %v643_v59 = vld [vmem:[#allocation3 + $0x78] sm:$0xf0]  ;;  %v642_v61 = vor.u32 %v726_v55, %v641_v54  ;;  %v614_v62 = vor.u32 %v717_v56, %v611_v57  ;;  %v937_v3 = vld [vmem:[%s984_s2] ss:$0 sm:$0xff]  ;;  %s899_s2 = smov [#allocation8]  }
  0x1d   :  { %314 = vmatpush.bf16.msra.mxu0 %v730_v8  ;;  %794 = vmatpush.bf16.msra.mxu2 %v730_v8  ;;  %v646_v63 = vor.u32 %v725_v58, %v643_v59  ;;  %v943_v7 = vld [vmem:[%s985_s3] ss:$0 sm:$0xff]  ;;  %s567_s3 = sshll.u32 %s899_s2, 4  ;;  %s568_s3 = int_to_ptr.vmem [resolvable:$true] %s567_s3 }
  0x1e   :  { %363 = vmatpush.bf16.msra.mxu1 %v738_v9  ;;  %802 = vmatpush.bf16.msra.mxu3 %v738_v9 }
  0x21   :  { %315 = vmatpush.bf16.msra.mxu0 %v729_v10  ;;  %795 = vmatpush.bf16.msra.mxu2 %v729_v10 }
  0x22   :  { %364 = vmatpush.bf16.msra.mxu1 %v737_v11  ;;  %803 = vmatpush.bf16.msra.mxu3 %v737_v11 }
  0x25   :  { %316 = vmatpush.bf16.msra.mxu0 %v728_v12  ;;  %796 = vmatpush.bf16.msra.mxu2 %v728_v12 }
  0x26   :  { %365 = vmatpush.bf16.msra.mxu1 %v736_v13  ;;  %804 = vmatpush.bf16.msra.mxu3 %v736_v13 }
  0x29   :  { %317 = vmatpush.bf16.msra.mxu0 %v727_v14  ;;  %797 = vmatpush.bf16.msra.mxu2 %v727_v14 }
  0x2a   :  { %366 = vmatpush.bf16.msra.mxu1 %v735_v15  ;;  %805 = vmatpush.bf16.msra.mxu3 %v735_v15 }
  0x2c   :  { %318 = vmatmul.bf16.vlgmr.msra.gmra.mxu0 %v586_v24  ;;  %338 = vmatmul.bf16.vlgmr.msra.gmra.mxu2 %v618_v25 }
  0x2d   :  { %367 = vmatmul.bf16.vlgmr.msra.gmra.mxu1 %v590_v26  ;;  %387 = vmatmul.bf16.vlgmr.msra.gmra.mxu3 %v622_v27 }
  0x3c   :  { %323 = vmatmul.bf16.gmra.mxu0 %v594_v36  ;;  %343 = vmatmul.bf16.gmra.mxu2 %v626_v37 }
  0x3d   :  { %372 = vmatmul.bf16.gmra.mxu1 %v598_v38  ;;  %392 = vmatmul.bf16.gmra.mxu3 %v630_v39 }
  0x4c   :  { %328 = vmatmul.bf16.gmra.mxu0 %v602_v48  ;;  %348 = vmatmul.bf16.gmra.mxu2 %v634_v49 }
  0x4d   :  { %377 = vmatmul.bf16.gmra.mxu1 %v606_v50  ;;  %397 = vmatmul.bf16.gmra.mxu3 %v638_v51 }
  0x5c   :  { %333 = vmatmul.bf16.gmra.mxu0 %v610_v60  ;;  %353 = vmatmul.bf16.gmra.mxu2 %v642_v61 }
  0x5d   :  { %382 = vmatmul.bf16.gmra.mxu1 %v614_v62  ;;  %402 = vmatmul.bf16.gmra.mxu3 %v646_v63 }
  0xa9   :  { %v319_v0 = vpop.f32.mrf.mxu0 }
  0xaa   :  { %v368_v1 = vpop.f32.mrf.mxu1 }
  0xab   :  { %v369_v2 = vadd.f32 %v368_v1, %v319_v0 }
  0xad   :  { %v463_v6 = vadd.f32 %v937_v3, %v369_v2 }
  0xaf   :  { %v339_v4 = vpop.f32.mrf.mxu2  ;;  %v499_v12 = vmul.f32 %v943_v7, %v463_v6  ;;  %vm479_vm0 = vcmp.gt.f32.partialorder %v463_v6, 0.0 }
  0xb0   :  { %v388_v5 = vpop.f32.mrf.mxu3 }
  0xb1   :  { %v321_v8 = vpop.f32.mrf.mxu0  ;;  %v389_v10 = vadd.f32 %v388_v5, %v339_v4  ;;  %v515_v18 = vsel %vm479_vm0, %v463_v6, %v499_v12 }
  0xb2   :  { %v370_v9 = vpop.f32.mrf.mxu1 }
  0xb3   :  { %v371_v11 = vadd.f32 %v370_v9, %v321_v8  ;;  %v471_v14 = vadd.f32 %v937_v3, %v389_v10 }
  0xb5   :  { %v464_v13 = vadd.f32 %v937_v3, %v371_v11  ;;  %v507_v24 = vmul.f32 %v943_v7, %v471_v14  ;;  %vm487_vm2 = vcmp.gt.f32.partialorder %v471_v14, 0.0 }
  0xb7   :  { %vm480_vm1 = vcmp.gt.f32.partialorder %v464_v13, 0.0  ;;  %v500_v15 = vmul.f32 %v943_v7, %v464_v13  ;;  %v341_v16 = vpop.f32.mrf.mxu2  ;;  %v523_v28 = vsel %vm487_vm2, %v471_v14, %v507_v24 }
  0xb8   :  { %v390_v17 = vpop.f32.mrf.mxu3 }
  0xb9   :  { %v516_v19 = vsel %vm480_vm1, %v464_v13, %v500_v15  ;;  %v391_v20 = vadd.f32 %v390_v17, %v341_v16  ;;  %v324_v21 = vpop.f32.mrf.mxu0 }
  0xba   :  { %v746_v22 = vpack.c.bf16 %v516_v19, %v515_v18  ;;  %v373_v23 = vpop.f32.mrf.mxu1 }
  0xbb   :  { %v472_v25 = vadd.f32 %v937_v3, %v391_v20  ;;  %v374_v27 = vadd.f32 %v373_v23, %v324_v21 }
  0xbc   :  { %747 = vst [vmem:[#allocation8] sm:$0xff] %v746_v22  }
  0xbd   :  { %vm488_vm3 = vcmp.gt.f32.partialorder %v472_v25, 0.0  ;;  %v508_v26 = vmul.f32 %v943_v7, %v472_v25  ;;  %v465_v33 = vadd.f32 %v937_v3, %v374_v27 }
  0xbf   :  { %v524_v29 = vsel %vm488_vm3, %v472_v25, %v508_v26  ;;  %v344_v30 = vpop.f32.mrf.mxu2  ;;  %v501_v38 = vmul.f32 %v943_v7, %v465_v33  ;;  %vm481_vm4 = vcmp.gt.f32.partialorder %v465_v33, 0.0 }
  0xc0   :  { %v766_v31 = vpack.c.bf16 %v524_v29, %v523_v28  ;;  %v393_v32 = vpop.f32.mrf.mxu3 }
  0xc1   :  { %v326_v34 = vpop.f32.mrf.mxu0  ;;  %v394_v36 = vadd.f32 %v393_v32, %v344_v30  ;;  %v517_v44 = vsel %vm481_vm4, %v465_v33, %v501_v38 }
  0xc2   :  { %786 = vst [vmem:[#allocation8 + $0x20] sm:$0xff] %v766_v31   ;;  %v375_v35 = vpop.f32.mrf.mxu1 }
  0xc3   :  { %v376_v37 = vadd.f32 %v375_v35, %v326_v34  ;;  %v473_v40 = vadd.f32 %v937_v3, %v394_v36 }
  0xc5   :  { %v466_v39 = vadd.f32 %v937_v3, %v376_v37  ;;  %v509_v50 = vmul.f32 %v943_v7, %v473_v40  ;;  %vm489_vm6 = vcmp.gt.f32.partialorder %v473_v40, 0.0 }
  0xc7   :  { %vm482_vm5 = vcmp.gt.f32.partialorder %v466_v39, 0.0  ;;  %v502_v41 = vmul.f32 %v943_v7, %v466_v39  ;;  %v346_v42 = vpop.f32.mrf.mxu2  ;;  %v525_v54 = vsel %vm489_vm6, %v473_v40, %v509_v50 }
  0xc8   :  { %v395_v43 = vpop.f32.mrf.mxu3 }
  0xc9   :  { %v518_v45 = vsel %vm482_vm5, %v466_v39, %v502_v41  ;;  %v396_v46 = vadd.f32 %v395_v43, %v346_v42  ;;  %v329_v47 = vpop.f32.mrf.mxu0 }
  0xca   :  { %v751_v48 = vpack.c.bf16 %v518_v45, %v517_v44  ;;  %v378_v49 = vpop.f32.mrf.mxu1 }
  0xcb   :  { %v474_v51 = vadd.f32 %v937_v3, %v396_v46  ;;  %v379_v53 = vadd.f32 %v378_v49, %v329_v47 }
  0xcc   :  { %783 = vst [vmem:[#allocation8 + $0x8] sm:$0xff] %v751_v48  }
  0xcd   :  { %vm490_vm7 = vcmp.gt.f32.partialorder %v474_v51, 0.0  ;;  %v510_v52 = vmul.f32 %v943_v7, %v474_v51  ;;  %v467_v59 = vadd.f32 %v937_v3, %v379_v53 }
  0xcf   :  { %v526_v55 = vsel %vm490_vm7, %v474_v51, %v510_v52  ;;  %v349_v56 = vpop.f32.mrf.mxu2  ;;  %v503_v0 = vmul.f32 %v943_v7, %v467_v59  ;;  %vm483_vm8 = vcmp.gt.f32.partialorder %v467_v59, 0.0 }
  0xd0   :  { %v771_v57 = vpack.c.bf16 %v526_v55, %v525_v54  ;;  %v398_v58 = vpop.f32.mrf.mxu3 }
  0xd1   :  { %v331_v60 = vpop.f32.mrf.mxu0  ;;  %v399_v62 = vadd.f32 %v398_v58, %v349_v56  ;;  %v519_v8 = vsel %vm483_vm8, %v467_v59, %v503_v0 }
  0xd2   :  { %787 = vst [vmem:[#allocation8 + $0x28] sm:$0xff] %v771_v57   ;;  %v380_v61 = vpop.f32.mrf.mxu1 }
  0xd3   :  { %v381_v63 = vadd.f32 %v380_v61, %v331_v60  ;;  %v475_v2 = vadd.f32 %v937_v3, %v399_v62 }
  0xd5   :  { %v468_v1 = vadd.f32 %v937_v3, %v381_v63  ;;  %v511_v14 = vmul.f32 %v943_v7, %v475_v2  ;;  %vm491_vm10 = vcmp.gt.f32.partialorder %v475_v2, 0.0 }
  0xd7   :  { %vm484_vm9 = vcmp.gt.f32.partialorder %v468_v1, 0.0  ;;  %v504_v4 = vmul.f32 %v943_v7, %v468_v1  ;;  %v351_v5 = vpop.f32.mrf.mxu2  ;;  %v527_v18 = vsel %vm491_vm10, %v475_v2, %v511_v14 }
  0xd8   :  { %v400_v6 = vpop.f32.mrf.mxu3 }
  0xd9   :  { %v520_v9 = vsel %vm484_vm9, %v468_v1, %v504_v4  ;;  %v401_v10 = vadd.f32 %v400_v6, %v351_v5  ;;  %v334_v11 = vpop.f32.mrf.mxu0 }
  0xda   :  { %v756_v12 = vpack.c.bf16 %v520_v9, %v519_v8  ;;  %v383_v13 = vpop.f32.mrf.mxu1 }
  0xdb   :  { %v476_v15 = vadd.f32 %v937_v3, %v401_v10  ;;  %v384_v17 = vadd.f32 %v383_v13, %v334_v11 }
  0xdc   :  { %784 = vst [vmem:[#allocation8 + $0x10] sm:$0xff] %v756_v12  }
  0xdd   :  { %vm492_vm11 = vcmp.gt.f32.partialorder %v476_v15, 0.0  ;;  %v512_v16 = vmul.f32 %v943_v7, %v476_v15  ;;  %v469_v23 = vadd.f32 %v937_v3, %v384_v17 }
  0xdf   :  { %v528_v19 = vsel %vm492_vm11, %v476_v15, %v512_v16  ;;  %v354_v20 = vpop.f32.mrf.mxu2  ;;  %v505_v28 = vmul.f32 %v943_v7, %v469_v23  ;;  %vm485_vm12 = vcmp.gt.f32.partialorder %v469_v23, 0.0 }
  0xe0   :  { %v776_v21 = vpack.c.bf16 %v528_v19, %v527_v18  ;;  %v403_v22 = vpop.f32.mrf.mxu3 }
  0xe1   :  { %v336_v24 = vpop.f32.mrf.mxu0  ;;  %v404_v26 = vadd.f32 %v403_v22, %v354_v20  ;;  %v521_v34 = vsel %vm485_vm12, %v469_v23, %v505_v28 }
  0xe2   :  { %788 = vst [vmem:[#allocation8 + $0x30] sm:$0xff] %v776_v21   ;;  %v385_v25 = vpop.f32.mrf.mxu1 }
  0xe3   :  { %v386_v27 = vadd.f32 %v385_v25, %v336_v24  ;;  %v477_v30 = vadd.f32 %v937_v3, %v404_v26 }
  0xe5   :  { %v470_v29 = vadd.f32 %v937_v3, %v386_v27  ;;  %v513_v38 = vmul.f32 %v943_v7, %v477_v30  ;;  %vm493_vm14 = vcmp.gt.f32.partialorder %v477_v30, 0.0 }
  0xe7   :  { %vm486_vm13 = vcmp.gt.f32.partialorder %v470_v29, 0.0  ;;  %v506_v31 = vmul.f32 %v943_v7, %v470_v29  ;;  %v356_v32 = vpop.f32.mrf.mxu2  ;;  %v529_v41 = vsel %vm493_vm14, %v477_v30, %v513_v38 }
  0xe8   :  { %v405_v33 = vpop.f32.mrf.mxu3 }
  0xe9   :  { %v522_v35 = vsel %vm486_vm13, %v470_v29, %v506_v31  ;;  %v406_v36 = vadd.f32 %v405_v33, %v356_v32 }
  0xea   :  { %v761_v37 = vpack.c.bf16 %v522_v35, %v521_v34 }
  0xeb   :  { %v478_v39 = vadd.f32 %v937_v3, %v406_v36 }
  0xec   :  { %785 = vst [vmem:[#allocation8 + $0x18] sm:$0xff] %v761_v37  }
  0xed   :  { %vm494_vm15 = vcmp.gt.f32.partialorder %v478_v39, 0.0  ;;  %v514_v40 = vmul.f32 %v943_v7, %v478_v39 }
  0xef   :  { %v530_v42 = vsel %vm494_vm15, %v478_v39, %v514_v40 }
  0xf0   :  { %v781_v43 = vpack.c.bf16 %v530_v42, %v529_v41 }
  0xf2   :  { %789 = vst [vmem:[#allocation8 + $0x38] sm:$0xff] %v781_v43  }
  0xf3   :  { %575 = dma.vmem_to_hbm [thread:$0]  %s568_s3, 1024, %s570_s7, [#allocation5], %s897_s27, %s897_s27, %s898_s28  }
  0xf4   :  { %891 = dma.done.wait [#allocation5], 1024  }
  0xf5   :  { %892 = vsyncadd [#allocation5], 4294966272 }
  0xf6   :  { %580 = vsyncpa [#allocation4], 1 }
  0xf7   :  { %581 = vsyncpa [#allocation7], 1 }
  0xf8   :  { %582 = vsyncpa [#allocation5], 1 }

</bundles_post_ra>
